<compile_context>
chip_gen: v7x
topology: tpu7x:2x2x1
jax: 0.10.0
libtpu: 0.0.40
codegen_flags: <defaults>
</compile_context>

<pallas_src>
import jax
import jax.numpy as jnp
from jax.experimental import pallas as pl
from jax.experimental.pallas import tpu as pltpu


def _round_up(n, m):
    return ((n + m - 1) // m) * m


def dqn_kernel(x_ref, w1_ref, w2_ref, w3_ref, w4_ref, b_ref, o_ref):
    h_pad = w1_ref.shape[1]          # padded hidden width (multiple of 128)
    out_size = o_ref.shape[1]        # true output width (no lane padding)
    cdt = w1_ref.dtype               # compute dtype for MXU operands (bf16/f32)

    b = b_ref[...]                   # (4, bw) f32, loaded once per tile

    # fc1 + relu   (activations cast to the MXU dtype, accumulate in f32)
    h = jnp.dot(x_ref[...].astype(cdt), w1_ref[...],
                preferred_element_type=jnp.float32)
    h = jnp.maximum(h + b[0:1, :h_pad], 0.0)
    # fc2 + relu
    h = jnp.dot(h.astype(cdt), w2_ref[...], preferred_element_type=jnp.float32)
    h = jnp.maximum(h + b[1:2, :h_pad], 0.0)
    # fc3 + relu
    h = jnp.dot(h.astype(cdt), w3_ref[...], preferred_element_type=jnp.float32)
    h = jnp.maximum(h + b[2:3, :h_pad], 0.0)
    # fc4 (no activation), stored at the true output width
    o = jnp.dot(h.astype(cdt), w4_ref[...], preferred_element_type=jnp.float32)
    o_ref[...] = (o + b[3:4, :out_size]).astype(o_ref.dtype)


def prepare_params(params, compute_dtype=jnp.bfloat16, lane_multiple=128):
    """Pad/pack weights ONCE (reuse the result across all forward calls).

    Weights are stored (in, out) = transpose of PyTorch's (out, in).
    Hidden width is zero-padded to a lane multiple (exact through ReLU/matmul).
    On v6e/v7x with H just above a 128 boundary, lane_multiple=256 better fills
    the 256x256 MXU; keep 128 for v5e / small H.
    """
    in_size, H = params["w1"].shape
    out_size = params["w4"].shape[1]
    h_pad = _round_up(H, lane_multiple)
    bw = max(h_pad, _round_up(out_size, 128))

    w1 = jnp.pad(params["w1"], ((0, 0), (0, h_pad - H))).astype(compute_dtype)
    w2 = jnp.pad(params["w2"], ((0, h_pad - H), (0, h_pad - H))).astype(compute_dtype)
    w3 = jnp.pad(params["w3"], ((0, h_pad - H), (0, h_pad - H))).astype(compute_dtype)
    # fc4 keeps its true output width (output store is not lane-padded).
    w4 = jnp.pad(params["w4"], ((0, h_pad - H), (0, 0))).astype(compute_dtype)

    # All biases packed into one (4, bw) f32 array -> single DMA, f32 adds.
    b = jnp.zeros((4, bw), jnp.float32)
    b = b.at[0, :H].set(params["b1"].reshape(-1))
    b = b.at[1, :H].set(params["b2"].reshape(-1))
    b = b.at[2, :H].set(params["b3"].reshape(-1))
    b = b.at[3, :out_size].set(params["b4"].reshape(-1))

    return {"w1": w1, "w2": w2, "w3": w3, "w4": w4, "b": b,
            "in_size": in_size, "h_pad": h_pad, "out_size": out_size}


def dqn_forward(x, prepared, *, tile_b=None):
    """x: (B, input_size) f32; prepared: output of prepare_params()."""
    B, in_size = x.shape
    assert in_size == prepared["in_size"]
    h_pad = prepared["h_pad"]
    out_size = prepared["out_size"]
    cdt = prepared["w1"].dtype
    bw = prepared["b"].shape[1]

    # Batch tiling: big tiles amortize per-grid-step overhead; multiples of 16
    # for bf16 sublane packing (8 suffices for f32).
    sub = 16 if cdt == jnp.bfloat16 else 8
    if tile_b is None:
        tile_b = min(512, _round_up(max(B, sub), sub))
    b_pad = _round_up(B, tile_b)
    xp = x if b_pad == B else jnp.pad(x, ((0, b_pad - B), (0, 0)))

    grid = (b_pad // tile_b,)

    # Single-buffer the VMEM-resident weights only when their footprint is big
    # enough to threaten the per-TC VMEM budget (v7x: 64 MiB/TC).
    wbytes = sum(int(prepared[k].size) * prepared[k].dtype.itemsize
                 for k in ("w1", "w2", "w3", "w4", "b"))
    const_mode = pl.Buffered(1) if wbytes > (4 << 20) else None

    def const_spec(shape):
        return pl.BlockSpec(shape, lambda i: (0,) * len(shape),
                            pipeline_mode=const_mode)

    flops = 2 * b_pad * (in_size * h_pad + 2 * h_pad * h_pad + h_pad * out_size)
    bytes_accessed = int(xp.size * 4 + wbytes + b_pad * out_size * 4)

    out = pl.pallas_call(
        dqn_kernel,
        out_shape=jax.ShapeDtypeStruct((b_pad, out_size), jnp.float32),
        grid_spec=pltpu.PrefetchScalarGridSpec(
            num_scalar_prefetch=0,
            grid=grid,
            in_specs=[
                # batch-tiled input (last dim == full array dim)
                pl.BlockSpec((tile_b, in_size), lambda i: (i, 0)),
                # weights / biases: constant index_maps -> VMEM-resident
                const_spec((in_size, h_pad)),
                const_spec((h_pad, h_pad)),
                const_spec((h_pad, h_pad)),
                const_spec((h_pad, out_size)),
                const_spec((4, bw)),
            ],
            out_specs=pl.BlockSpec((tile_b, out_size), lambda i: (i, 0)),
        ),
        compiler_params=pltpu.CompilerParams(
            dimension_semantics=("parallel",),     # shard batch tiles on v7x
            vmem_limit_bytes=64 * 1024 * 1024,
        ),
        cost_estimate=pl.CostEstimate(
            flops=flops, transcendentals=0, bytes_accessed=bytes_accessed),
    )(xp, prepared["w1"], prepared["w2"], prepared["w3"], prepared["w4"],
      prepared["b"])

    return out if b_pad == B else out[:B]


def init_params(key, input_size, hidden_size, output_size):
    """Deterministic init mimicking nn.Linear defaults (uniform +-1/sqrt(fan_in))."""
    dims = [(input_size, hidden_size),
            (hidden_size, hidden_size),
            (hidden_size, hidden_size),
            (hidden_size, output_size)]
    params = {}
    for i, (fan_in, fan_out) in enumerate(dims, start=1):
        key, kw, kb = jax.random.split(key, 3)
        bound = 1.0 / jnp.sqrt(float(fan_in))
        # stored as (in, out) = transpose of PyTorch's (out, in)
        params[f"w{i}"] = jax.random.uniform(
            kw, (fan_in, fan_out), jnp.float32, -bound, bound)
        params[f"b{i}"] = jax.random.uniform(
            kb, (1, fan_out), jnp.float32, -bound, bound)
    return params


def dqn_reference(x, params):
    h = x
    for i in (1, 2, 3):
        h = jnp.maximum(h @ params[f"w{i}"] + params[f"b{i}"], 0.0)
    return h @ params["w4"] + params["b4"]


if __name__ == "__main__":
    key = jax.random.PRNGKey(0)
    batch, input_size, hidden_size, output_size = 8, 32, 64, 8

    key, kx = jax.random.split(key)
    x = jax.random.normal(kx, (batch, input_size), jnp.float32)
    params = init_params(key, input_size, hidden_size, output_size)
    ref = dqn_reference(x, params)

    # f32 compute path: bit-faithful parity with the reference.
    prep_f32 = prepare_params(params, compute_dtype=jnp.float32)
    out_f32 = jax.block_until_ready(dqn_forward(x, prep_f32))
    assert out_f32.shape == (batch, output_size)
    assert jnp.allclose(out_f32, ref, atol=1e-5, rtol=1e-5)

    # bf16 compute path (fast MXU path): looser tolerance vs the f32 reference.
    prep_bf16 = prepare_params(params, compute_dtype=jnp.bfloat16)
    out_bf16 = jax.block_until_ready(dqn_forward(x, prep_bf16))
    assert out_bf16.shape == (batch, output_size)
    assert jnp.allclose(out_bf16, ref, atol=5e-2, rtol=5e-2)

    print("KERNEL_OK")
</pallas_src>

<mosaic_0001>
module attributes {stable_mosaic.version = 11 : i64} {
  func.func @dqn_kernel(%arg0: i32, %arg1: memref<8x32xf32, #tpu.memory_space<vmem>>, %arg2: memref<32x128xf32, #tpu.memory_space<vmem>>, %arg3: memref<128x128xf32, #tpu.memory_space<vmem>>, %arg4: memref<128x128xf32, #tpu.memory_space<vmem>>, %arg5: memref<128x8xf32, #tpu.memory_space<vmem>>, %arg6: memref<4x128xf32, #tpu.memory_space<vmem>>, %arg7: memref<8x8xf32, #tpu.memory_space<vmem>>) attributes {dimension_semantics = [#tpu.dimension_semantics<parallel>], iteration_bounds = array<i64: 1>, scalar_prefetch = 0 : i64, scratch_operands = 0 : i64, tpu.core_type = #tpu.core_type<tc>, window_params = [{transform_indices = @transform_0, window_bounds = array<i64: 8, 32>}, {pipeline_mode = #tpu.pipeline_mode<synchronous>, transform_indices = @transform_1, window_bounds = array<i64: 32, 128>}, {pipeline_mode = #tpu.pipeline_mode<synchronous>, transform_indices = @transform_2, window_bounds = array<i64: 128, 128>}, {pipeline_mode = #tpu.pipeline_mode<synchronous>, transform_indices = @transform_3, window_bounds = array<i64: 128, 128>}, {pipeline_mode = #tpu.pipeline_mode<synchronous>, transform_indices = @transform_4, window_bounds = array<i64: 128, 8>}, {pipeline_mode = #tpu.pipeline_mode<synchronous>, transform_indices = @transform_5, window_bounds = array<i64: 4, 128>}, {transform_indices = @transform_6, window_bounds = array<i64: 8, 8>}]} {
    %c0 = arith.constant 0 : index
    %c0_0 = arith.constant 0 : index
    %0 = vector.load %arg6[%c0, %c0_0] : memref<4x128xf32, #tpu.memory_space<vmem>>, vector<4x128xf32>
    %c0_1 = arith.constant 0 : index
    %c0_2 = arith.constant 0 : index
    %1 = vector.load %arg1[%c0_1, %c0_2] : memref<8x32xf32, #tpu.memory_space<vmem>>, vector<8x32xf32>
    %c0_3 = arith.constant 0 : index
    %c0_4 = arith.constant 0 : index
    %2 = vector.load %arg2[%c0_3, %c0_4] : memref<32x128xf32, #tpu.memory_space<vmem>>, vector<32x128xf32>
    %cst = arith.constant dense<0.000000e+00> : vector<8x128xf32>
    %3 = tpu.matmul %1, %2, %cst {dimension_numbers = #tpu.dot_dimension_numbers<[1], [0], [0], [1], [0, 0, 1, 1], [], []>} : vector<8x32xf32>, vector<32x128xf32>, vector<8x128xf32> -> vector<8x128xf32>
    %4 = vector.extract_strided_slice %0 {offsets = [0, 0], sizes = [1, 128], strides = [1, 1]} : vector<4x128xf32> to vector<1x128xf32>
    %5 = vector.broadcast %4 : vector<1x128xf32> to vector<8x128xf32>
    %6 = arith.addf %3, %5 : vector<8x128xf32>
    %cst_5 = arith.constant 0.000000e+00 : f32
    %7 = vector.broadcast %cst_5 : f32 to vector<8x128xf32>
    %8 = arith.maximumf %6, %7 : vector<8x128xf32>
    %c0_6 = arith.constant 0 : index
    %c0_7 = arith.constant 0 : index
    %9 = vector.load %arg3[%c0_6, %c0_7] : memref<128x128xf32, #tpu.memory_space<vmem>>, vector<128x128xf32>
    %cst_8 = arith.constant dense<0.000000e+00> : vector<8x128xf32>
    %10 = tpu.matmul %8, %9, %cst_8 {dimension_numbers = #tpu.dot_dimension_numbers<[1], [0], [0], [1], [0, 0, 1, 1], [], []>} : vector<8x128xf32>, vector<128x128xf32>, vector<8x128xf32> -> vector<8x128xf32>
    %11 = vector.extract_strided_slice %0 {offsets = [1, 0], sizes = [1, 128], strides = [1, 1]} : vector<4x128xf32> to vector<1x128xf32>
    %12 = vector.broadcast %11 : vector<1x128xf32> to vector<8x128xf32>
    %13 = arith.addf %10, %12 : vector<8x128xf32>
    %cst_9 = arith.constant 0.000000e+00 : f32
    %14 = vector.broadcast %cst_9 : f32 to vector<8x128xf32>
    %15 = arith.maximumf %13, %14 : vector<8x128xf32>
    %c0_10 = arith.constant 0 : index
    %c0_11 = arith.constant 0 : index
    %16 = vector.load %arg4[%c0_10, %c0_11] : memref<128x128xf32, #tpu.memory_space<vmem>>, vector<128x128xf32>
    %cst_12 = arith.constant dense<0.000000e+00> : vector<8x128xf32>
    %17 = tpu.matmul %15, %16, %cst_12 {dimension_numbers = #tpu.dot_dimension_numbers<[1], [0], [0], [1], [0, 0, 1, 1], [], []>} : vector<8x128xf32>, vector<128x128xf32>, vector<8x128xf32> -> vector<8x128xf32>
    %18 = vector.extract_strided_slice %0 {offsets = [2, 0], sizes = [1, 128], strides = [1, 1]} : vector<4x128xf32> to vector<1x128xf32>
    %19 = vector.broadcast %18 : vector<1x128xf32> to vector<8x128xf32>
    %20 = arith.addf %17, %19 : vector<8x128xf32>
    %cst_13 = arith.constant 0.000000e+00 : f32
    %21 = vector.broadcast %cst_13 : f32 to vector<8x128xf32>
    %22 = arith.maximumf %20, %21 : vector<8x128xf32>
    %c0_14 = arith.constant 0 : index
    %c0_15 = arith.constant 0 : index
    %23 = vector.load %arg5[%c0_14, %c0_15] : memref<128x8xf32, #tpu.memory_space<vmem>>, vector<128x8xf32>
    %cst_16 = arith.constant dense<0.000000e+00> : vector<8x8xf32>
    %24 = tpu.matmul %22, %23, %cst_16 {dimension_numbers = #tpu.dot_dimension_numbers<[1], [0], [0], [1], [0, 0, 1, 1], [], []>} : vector<8x128xf32>, vector<128x8xf32>, vector<8x8xf32> -> vector<8x8xf32>
    %25 = vector.extract_strided_slice %0 {offsets = [3, 0], sizes = [1, 8], strides = [1, 1]} : vector<4x128xf32> to vector<1x8xf32>
    %26 = vector.broadcast %25 : vector<1x8xf32> to vector<8x8xf32>
    %27 = arith.addf %24, %26 : vector<8x8xf32>
    %c0_17 = arith.constant 0 : index
    %c0_18 = arith.constant 0 : index
    %28 = vector.load %arg7[%c0_17, %c0_18] : memref<8x8xf32, #tpu.memory_space<vmem>>, vector<8x8xf32>
    tpu.vector_store %arg7[%c0_17, %c0_18], %27 {strides = array<i32>} : memref<8x8xf32, #tpu.memory_space<vmem>>, vector<8x8xf32>,
    return
  }
  func.func @transform_0(%arg0: i32) -> (i32, i32) {
    %c0_i32 = arith.constant 0 : i32
    %c0_i32_0 = arith.constant 0 : i32
    return %arg0, %c0_i32 : i32, i32
  }
  func.func @transform_1(%arg0: i32) -> (i32, i32) {
    %c0_i32 = arith.constant 0 : i32
    %c0_i32_0 = arith.constant 0 : i32
    %c0_i32_1 = arith.constant 0 : i32
    return %c0_i32, %c0_i32_0 : i32, i32
  }
  func.func @transform_2(%arg0: i32) -> (i32, i32) {
    %c0_i32 = arith.constant 0 : i32
    %c0_i32_0 = arith.constant 0 : i32
    %c0_i32_1 = arith.constant 0 : i32
    return %c0_i32, %c0_i32_0 : i32, i32
  }
  func.func @transform_3(%arg0: i32) -> (i32, i32) {
    %c0_i32 = arith.constant 0 : i32
    %c0_i32_0 = arith.constant 0 : i32
    %c0_i32_1 = arith.constant 0 : i32
    return %c0_i32, %c0_i32_0 : i32, i32
  }
  func.func @transform_4(%arg0: i32) -> (i32, i32) {
    %c0_i32 = arith.constant 0 : i32
    %c0_i32_0 = arith.constant 0 : i32
    %c0_i32_1 = arith.constant 0 : i32
    return %c0_i32, %c0_i32_0 : i32, i32
  }
  func.func @transform_5(%arg0: i32) -> (i32, i32) {
    %c0_i32 = arith.constant 0 : i32
    %c0_i32_0 = arith.constant 0 : i32
    %c0_i32_1 = arith.constant 0 : i32
    return %c0_i32, %c0_i32_0 : i32, i32
  }
  func.func @transform_6(%arg0: i32) -> (i32, i32) {
    %c0_i32 = arith.constant 0 : i32
    %c0_i32_0 = arith.constant 0 : i32
    return %arg0, %c0_i32 : i32, i32
  }
}

</mosaic_0001>

<bundles_post_ra>
// kernel: tpu_custom_call.1
= control target key start
LH: loop header
LB: loop body
LE: loop exit
PB: predicated region body
PF: predicated region fallthrough
CT: control target
= control target key end

     0   :  { %11 = vsyncpa [#allocation3], 0  ;;  %s1095_s0 = inlined_call_operand.hbm [shape: f32[8,32], index: 0, kind: input, shape index: {}]   ;;  %s1096_s1 = inlined_call_operand.hbm [shape: f32[32,128], index: 1, kind: input, shape index: {}]   ;;  %s1097_s2 = inlined_call_operand.hbm [shape: f32[128,128], index: 2, kind: input, shape index: {}]   ;;  %s1098_s3 = inlined_call_operand.hbm [shape: f32[128,128], index: 3, kind: input, shape index: {}]   ;;  %s1099_s4 = inlined_call_operand.hbm [shape: f32[128,8], index: 4, kind: input, shape index: {}]   ;;  %s1100_s5 = inlined_call_operand.hbm [shape: f32[4,128], index: 5, kind: input, shape index: {}]   ;;  %s1101_s6 = inlined_call_operand.hbm [shape: f32[8,8], index: 6, kind: output, shape index: {}]  }
   0x1   :  { %12 = vsyncpa [#allocation6], 0 }
   0x2   :  { %13 = vsyncpa [#allocation9], 0 }
   0x3   :  { %14 = vsyncpa [#allocation12], 0 }
   0x4   :  { %15 = vsyncpa [#allocation4], 0  ;;  %s906_s21 = smov [#allocation5]   ;;  %s742_s25 = scalar_lea.hbm %s1096_s1, 512 }
   0x5   :  { %s31_s22 = sshll.u32 %s906_s21, 4  ;;  %p743_p0 = scmp.ne.s32.totalorder %s1096_s1, %s742_s25  ;;  %s32_s22 = int_to_ptr.vmem [resolvable:$true] %s31_s22 }
   0x6   :  { %p746_p1 = scmp.lt.u32.totalorder %s742_s25, %s1096_s1 }
   0x8   :  { %p748_p2 = pnand %p746_p1, %p743_p0 }
   0xa   :  { %751 = shalt.err (!%p748_p2)
}
   0xb   :  { %s752_s30 = scalar_lea.vmem %s32_s22, 512  ;;  %p757_p4 = scmp.lt.s32.totalorder %s32_s22, %s32_s22 }
   0xc   :  { %p753_p3 = scmp.ne.s32.totalorder %s32_s22, %s752_s30  ;;  %p758_p5 = scmp.lt.s32.totalorder %s752_s30, %s752_s30 }
   0xe   :  { %p759_p6 = por %p758_p5, %p757_p4 }
  0x10   :  { %p760_p7 = pnand %p759_p6, %p753_p3 }
  0x12   :  { %763 = shalt.err (!%p760_p7)
}
  0x13   :  { %s907_s7 = smov 128   ;;  %s908_s8 = smov 8  }
  0x14   :  { %37 = dma.hbm_to_vmem [thread:$0]  %s1096_s1, 512, %s32_s22, [#allocation6], %s907_s7, %s907_s7, %s908_s8  }
  0x15   :  { %s909_s11 = smov [#allocation8]   ;;  %s910_s13 = smov [#allocation2]  }
  0x16   :  { %s55_s12 = sshll.u32 %s909_s11, 4  ;;  %s22_s14 = sshll.u32 %s910_s13, 4  ;;  %s56_s12 = int_to_ptr.vmem [resolvable:$true] %s55_s12  ;;  %s23_s14 = int_to_ptr.vmem [resolvable:$true] %s22_s14 }
  0x17   :  { %s764_s17 = scalar_lea.hbm %s1098_s3, 2048 }
  0x18   :  { %p765_p8 = scmp.ne.s32.totalorder %s1098_s3, %s764_s17  ;;  %p768_p9 = scmp.lt.u32.totalorder %s764_s17, %s1098_s3 }
  0x1a   :  { %p770_p10 = pnand %p768_p9, %p765_p8 }
  0x1c   :  { %773 = shalt.err (!%p770_p10)
}
  0x1d   :  { %s774_s1 = scalar_lea.vmem %s56_s12, 2048  ;;  %p779_p12 = scmp.lt.s32.totalorder %s56_s12, %s56_s12 }
  0x1e   :  { %p775_p11 = scmp.ne.s32.totalorder %s56_s12, %s774_s1  ;;  %p780_p13 = scmp.lt.s32.totalorder %s774_s1, %s774_s1 }
  0x20   :  { %p781_p0 = por %p780_p13, %p779_p12 }
  0x22   :  { %p782_p1 = pnand %p781_p0, %p775_p11 }
  0x24   :  { %785 = shalt.err (!%p782_p1)
}
  0x25   :  { %61 = dma.hbm_to_vmem [thread:$0]  %s1098_s3, 2048, %s56_s12, [#allocation9], %s907_s7, %s907_s7, %s908_s8  }
  0x26   :  { %s786_s26 = scalar_lea.hbm %s1095_s0, 128 }
  0x27   :  { %p787_p2 = scmp.ne.s32.totalorder %s1095_s0, %s786_s26  ;;  %p790_p3 = scmp.lt.u32.totalorder %s786_s26, %s1095_s0 }
  0x29   :  { %p792_p4 = pnand %p790_p3, %p787_p2 }
  0x2b   :  { %795 = shalt.err (!%p792_p4)
}
  0x2c   :  { %s796_s9 = scalar_lea.vmem %s23_s14, 128  ;;  %p801_p6 = scmp.lt.s32.totalorder %s23_s14, %s23_s14 }
  0x2d   :  { %p797_p5 = scmp.ne.s32.totalorder %s23_s14, %s796_s9  ;;  %p802_p7 = scmp.lt.s32.totalorder %s796_s9, %s796_s9 }
  0x2f   :  { %p803_p8 = por %p802_p7, %p801_p6 }
  0x31   :  { %p804_p9 = pnand %p803_p8, %p797_p5 }
  0x33   :  { %807 = shalt.err (!%p804_p9)
}
  0x34   :  { %25 = dma.hbm_to_vmem [thread:$0]  %s1095_s0, 128, %s23_s14, [#allocation3]  }
  0x35   :  { %s911_s11 = smov [#allocation7]   ;;  %s912_s13 = smov [#allocation10]  }
  0x36   :  { %s43_s12 = sshll.u32 %s911_s11, 4  ;;  %s67_s15 = sshll.u32 %s912_s13, 4  ;;  %s44_s12 = int_to_ptr.vmem [resolvable:$true] %s43_s12  ;;  %s68_s15 = int_to_ptr.vmem [resolvable:$true] %s67_s15 }
  0x37   :  { %s808_s18 = scalar_lea.hbm %s1097_s2, 2048 }
  0x38   :  { %p809_p10 = scmp.ne.s32.totalorder %s1097_s2, %s808_s18  ;;  %p812_p11 = scmp.lt.u32.totalorder %s808_s18, %s1097_s2 }
  0x3a   :  { %p814_p12 = pnand %p812_p11, %p809_p10 }
  0x3c   :  { %817 = shalt.err (!%p814_p12)
}
  0x3d   :  { %s818_s0 = scalar_lea.vmem %s44_s12, 2048  ;;  %p823_p0 = scmp.lt.s32.totalorder %s44_s12, %s44_s12 }
  0x3e   :  { %p819_p13 = scmp.ne.s32.totalorder %s44_s12, %s818_s0  ;;  %p824_p1 = scmp.lt.s32.totalorder %s818_s0, %s818_s0 }
  0x40   :  { %p825_p2 = por %p824_p1, %p823_p0 }
  0x42   :  { %p826_p3 = pnand %p825_p2, %p819_p13 }
  0x44   :  { %829 = shalt.err (!%p826_p3)
}
  0x45   :  { %49 = dma.hbm_to_vmem [thread:$0]  %s1097_s2, 2048, %s44_s12, [#allocation6], %s907_s7, %s907_s7, %s908_s8  }
  0x46   :  { %s830_s25 = scalar_lea.hbm %s1099_s4, 2048 }
  0x47   :  { %p831_p4 = scmp.ne.s32.totalorder %s1099_s4, %s830_s25  ;;  %p834_p5 = scmp.lt.u32.totalorder %s830_s25, %s1099_s4 }
  0x49   :  { %p836_p6 = pnand %p834_p5, %p831_p4 }
  0x4b   :  { %839 = shalt.err (!%p836_p6)
}
  0x4c   :  { %s840_s30 = scalar_lea.vmem %s68_s15, 2048  ;;  %p845_p8 = scmp.lt.s32.totalorder %s68_s15, %s68_s15 }
  0x4d   :  { %p841_p7 = scmp.ne.s32.totalorder %s68_s15, %s840_s30  ;;  %p846_p9 = scmp.lt.s32.totalorder %s840_s30, %s840_s30 }
  0x4f   :  { %p847_p10 = por %p846_p9, %p845_p8 }
  0x51   :  { %p848_p11 = pnand %p847_p10, %p841_p7 }
  0x53   :  { %851 = shalt.err (!%p848_p11)
}
  0x54   :  { %73 = dma.hbm_to_vmem [thread:$0]  %s1099_s4, 2048, %s68_s15, [#allocation9], %s907_s7, %s907_s7, %s908_s8  }
  0x55   :  { %s913_s3 = smov [#allocation11]   ;;  %s852_s13 = scalar_lea.hbm %s1100_s5, 64 }
  0x56   :  { %s80_s10 = sshll.u32 %s913_s3, 4  ;;  %p853_p12 = scmp.ne.s32.totalorder %s1100_s5, %s852_s13  ;;  %s81_s10 = int_to_ptr.vmem [resolvable:$true] %s80_s10 }
  0x57   :  { %p856_p13 = scmp.lt.u32.totalorder %s852_s13, %s1100_s5 }
  0x59   :  { %p858_p0 = pnand %p856_p13, %p853_p12 }
  0x5b   :  { %861 = shalt.err (!%p858_p0)
}
  0x5c   :  { %s862_s20 = scalar_lea.vmem %s81_s10, 64  ;;  %p867_p2 = scmp.lt.s32.totalorder %s81_s10, %s81_s10 }
  0x5d   :  { %p863_p1 = scmp.ne.s32.totalorder %s81_s10, %s862_s20  ;;  %p868_p3 = scmp.lt.s32.totalorder %s862_s20, %s862_s20 }
  0x5f   :  { %p869_p4 = por %p868_p3, %p867_p2 }
  0x61   :  { %p870_p5 = pnand %p869_p4, %p863_p1 }
  0x63   :  { %873 = shalt.err (!%p870_p5)
}
  0x64   :  { %83 = dma.hbm_to_vmem [thread:$0]  %s1100_s5, 64, %s81_s10, [#allocation12]  }
  0x65   :  { %896 = dma.done.wait [#allocation3], 128  }
  0x66   :  { %897 = vsyncadd [#allocation3], 4294967168 }
  0x67   :  { %898 = dma.done.wait [#allocation6], 2560  }
  0x68   :  { %899 = vsyncadd [#allocation6], 4294964736 }
  0x69   :  { %900 = dma.done.wait [#allocation9], 4096  }
  0x6a   :  { %901 = vsyncadd [#allocation9], 4294963200 }
  0x6b   :  { %902 = dma.done.wait [#allocation12], 64  }
  0x6c   :  { %903 = vsyncadd [#allocation12], 4294967232  ;;  %v914_v0 = vmov 0.0|0.0   ;;  %vm915_vm0 = vmmov 0   ;;  %v916_v1 = vmov 0.0   ;;  %v104_v2 = vld [vmem:[#allocation5] sm:$0xff]  ;;  %v108_v54 = vlaneseq }
  0x6d   :  { %652 = vmatprep.subr.bf16.mxu0 %v914_v0  ;;  %544 = vmatprep.mubr.msk.f32.mxu0 %vm915_vm0, %v916_v1  ;;  %v105_v3 = vld [vmem:[#allocation5 + $0x8] sm:$0xff]  ;;  %v106_v4 = vld [vmem:[#allocation5 + $0x10] sm:$0xff]  ;;  %v107_v6 = vld [vmem:[#allocation5 + $0x18] sm:$0xff]  ;;  %vm112_vm1 = vcmask 261120   ;;  %s917_s5 = smov [#allocation13]   ;;  %vm459_vm2 = vcmask 64512  }
  0x6e   :  { %658 = vmatprep.subr.bf16.mxu1 %v914_v0  ;;  %579 = vmatprep.mubr.msk.f32.mxu1 %vm915_vm0, %v916_v1  ;;  %v653_v5 = vpack.c.bf16 %v105_v3, %v104_v2  ;;  %v187_v7 = vld [vmem:[#allocation7] sm:$0xff]  ;;  %v188_v8 = vld [vmem:[#allocation7 + $0x8] sm:$0xff]  ;;  %v189_v9 = vld [vmem:[#allocation7 + $0x10] sm:$0xff]  ;;  %v656_v11 = vpack.c.bf16 %v107_v6, %v106_v4  ;;  %v1062_v55 = vshrl.u32 %v108_v54, 7  ;;  %s467_s8 = sshll.u32 %s917_s5, 4  ;;  %s468_s8 = int_to_ptr.vmem [resolvable:$true] %s467_s8 }
  0x6f   :  { %v190_v10 = vld [vmem:[#allocation7 + $0x18] sm:$0xff]  ;;  %v659_v12 = vpack.c.bf16 %v188_v8, %v187_v7  ;;  %v191_v14 = vld [vmem:[#allocation7 + $0x20] sm:$0xff]  ;;  %v192_v15 = vld [vmem:[#allocation7 + $0x28] sm:$0xff]  ;;  %s874_s15 = scalar_lea.vmem %s468_s8, 128  ;;  %p879_p7 = scmp.lt.s32.totalorder %s468_s8, %s468_s8 }
  0x70   :  { %654 = vmatpush3.bf16.msra.mxu0 %v653_v5  ;;  %v662_v13 = vpack.c.bf16 %v190_v10, %v189_v9  ;;  %v103_v16 = vld [vmem:[#allocation2] sm:$0xff]  ;;  %v665_v17 = vpack.c.bf16 %v192_v15, %v191_v14  ;;  %v193_v18 = vld [vmem:[#allocation7 + $0x30] sm:$0xff]  ;;  %v195_v21 = vld [vmem:[#allocation7 + $0x40] sm:$0xff]  ;;  %v110_v56 = vsub.s32 0, %v1062_v55  ;;  %p875_p6 = scmp.ne.s32.totalorder %s468_s8, %s874_s15  ;;  %p880_p8 = scmp.lt.s32.totalorder %s874_s15, %s874_s15 }
  0x71   :  { %655 = vmatprep.subr.bf16.mxu0 %v914_v0  ;;  %660 = vmatpush3.bf16.msra.mxu1 %v659_v12  ;;  %v194_v19 = vld [vmem:[#allocation7 + $0x38] sm:$0xff]  ;;  %v196_v22 = vld [vmem:[#allocation7 + $0x48] sm:$0xff]  ;;  %v197_v24 = vld [vmem:[#allocation7 + $0x50] sm:$0xff] }
  0x72   :  { %661 = vmatprep.subr.bf16.mxu1 %v914_v0  ;;  %v668_v20 = vpack.c.bf16 %v194_v19, %v193_v18  ;;  %v671_v23 = vpack.c.bf16 %v196_v22, %v195_v21  ;;  %v198_v25 = vld [vmem:[#allocation7 + $0x58] sm:$0xff]  ;;  %v199_v27 = vld [vmem:[#allocation7 + $0x60] sm:$0xff]  ;;  %v200_v28 = vld [vmem:[#allocation7 + $0x68] sm:$0xff]  ;;  %p881_p9 = por %p880_p8, %p879_p7 }
  0x73   :  { %v674_v26 = vpack.c.bf16 %v198_v25, %v197_v24  ;;  %v677_v29 = vpack.c.bf16 %v200_v28, %v199_v27  ;;  %v201_v30 = vld [vmem:[#allocation7 + $0x70] sm:$0xff]  ;;  %v202_v31 = vld [vmem:[#allocation7 + $0x78] sm:$0xff]  ;;  %v278_v33 = vld [vmem:[#allocation8] sm:$0xff]  ;;  %v205_v24 = vsub.s32 1, %v1062_v55 }
  0x74   :  { %657 = vmatpush3.bf16.msra.mxu0 %v656_v11  ;;  %v680_v32 = vpack.c.bf16 %v202_v31, %v201_v30  ;;  %v279_v34 = vld [vmem:[#allocation8 + $0x8] sm:$0xff]  ;;  %v280_v35 = vld [vmem:[#allocation8 + $0x10] sm:$0xff]  ;;  %v281_v37 = vld [vmem:[#allocation8 + $0x18] sm:$0xff]  ;;  %p882_p10 = pnand %p881_p9, %p875_p6 }
  0x75   :  { %682 = vmatprep.subr.bf16.mxu0 %v914_v0  ;;  %663 = vmatpush3.bf16.msra.mxu1 %v662_v13  ;;  %v683_v36 = vpack.c.bf16 %v279_v34, %v278_v33  ;;  %v686_v38 = vpack.c.bf16 %v281_v37, %v280_v35  ;;  %v282_v39 = vld [vmem:[#allocation8 + $0x20] sm:$0xff]  ;;  %v283_v40 = vld [vmem:[#allocation8 + $0x28] sm:$0xff]  ;;  %v284_v42 = vld [vmem:[#allocation8 + $0x30] sm:$0xff]  ;;  %v296_v33 = vsub.s32 2, %v1062_v55 }
  0x76   :  { %664 = vmatprep.subr.bf16.mxu1 %v914_v0  ;;  %v689_v41 = vpack.c.bf16 %v283_v40, %v282_v39  ;;  %v285_v43 = vld [vmem:[#allocation8 + $0x38] sm:$0xff]  ;;  %v286_v45 = vld [vmem:[#allocation8 + $0x40] sm:$0xff]  ;;  %v287_v46 = vld [vmem:[#allocation8 + $0x48] sm:$0xff] }
  0x77   :  { %545 = vmatmul.mubr.msk.f32.vlgmr.msra.gmra.mrb[0].mxu0 %vm112_vm1, %v103_v16  ;;  %v692_v44 = vpack.c.bf16 %v285_v43, %v284_v42  ;;  %v695_v47 = vpack.c.bf16 %v287_v46, %v286_v45  ;;  %v288_v48 = vld [vmem:[#allocation8 + $0x50] sm:$0xff]  ;;  %v289_v49 = vld [vmem:[#allocation8 + $0x58] sm:$0xff]  ;;  %v290_v51 = vld [vmem:[#allocation8 + $0x60] sm:$0xff] }
  0x78   :  { %614 = vmatprep.mubr.msk.f32.mxu0 %vm915_vm0, %v916_v1  ;;  %684 = vmatpush3.bf16.msra.mxu0 %v683_v36  ;;  %v698_v50 = vpack.c.bf16 %v289_v49, %v288_v48  ;;  %v291_v52 = vld [vmem:[#allocation8 + $0x68] sm:$0xff]  ;;  %v1065_v57 = vld [vmem:[#allocation11] sm:$0xf]  ;;  %v292_v63 = vld [vmem:[#allocation8 + $0x70] sm:$0xff] }
  0x79   :  { %666 = vmatpush3.bf16.msra.mxu1 %v665_v17  ;;  %685 = vmatprep.subr.bf16.mxu0 %v914_v0  ;;  %v701_v53 = vpack.c.bf16 %v291_v52, %v290_v51  ;;  %v111_v58 = vrot.slane %v1065_v57, %v110_v56  ;;  %v293_v2 = vld [vmem:[#allocation8 + $0x78] sm:$0xff]  ;;  %v369_v4 = vld [vmem:[#allocation10] sm:$0xff]  ;;  %v370_v5 = vld [vmem:[#allocation10 + $0x8] sm:$0xff]  ;;  %v206_v25 = vrot.slane %v1065_v57, %v205_v24 }
  0x7a   :  { %667 = vmatprep.subr.bf16.mxu1 %v914_v0  ;;  %v704_v3 = vpack.c.bf16 %v293_v2, %v292_v63  ;;  %v371_v6 = vld [vmem:[#allocation10 + $0x10] sm:$0xff]  ;;  %v707_v7 = vpack.c.bf16 %v370_v5, %v369_v4  ;;  %v372_v8 = vld [vmem:[#allocation10 + $0x18] sm:$0xff]  ;;  %v373_v10 = vld [vmem:[#allocation10 + $0x20] sm:$0xff]  ;;  %v297_v34 = vrot.slane %v1065_v57, %v296_v33 }
  0x7b   :  { %v710_v9 = vpack.c.bf16 %v372_v8, %v371_v6  ;;  %v374_v11 = vld [vmem:[#allocation10 + $0x28] sm:$0xff]  ;;  %v376_v13 = vld [vmem:[#allocation10 + $0x38] sm:$0xff]  ;;  %v377_v15 = vld [vmem:[#allocation10 + $0x40] sm:$0xff] }
  0x7c   :  { %687 = vmatpush3.bf16.msra.mxu0 %v686_v38  ;;  %v713_v12 = vpack.c.bf16 %v374_v11, %v373_v10  ;;  %v378_v16 = vld [vmem:[#allocation10 + $0x48] sm:$0xff]  ;;  %v379_v18 = vld [vmem:[#allocation10 + $0x50] sm:$0xff]  ;;  %v380_v19 = vld [vmem:[#allocation10 + $0x58] sm:$0xff]  ;;  %v387_v38 = vsub.s32 3, %v1062_v55 }
  0x7d   :  { %669 = vmatpush3.bf16.msra.mxu1 %v668_v20  ;;  %688 = vmatprep.subr.bf16.mxu0 %v914_v0  ;;  %v719_v17 = vpack.c.bf16 %v378_v16, %v377_v15  ;;  %v722_v20 = vpack.c.bf16 %v380_v19, %v379_v18  ;;  %v381_v21 = vld [vmem:[#allocation10 + $0x60] sm:$0xff]  ;;  %v382_v22 = vld [vmem:[#allocation10 + $0x68] sm:$0xff]  ;;  %v383_v30 = vld [vmem:[#allocation10 + $0x70] sm:$0xff] }
  0x7e   :  { %670 = vmatprep.subr.bf16.mxu1 %v914_v0  ;;  %v384_v31 = vld [vmem:[#allocation10 + $0x78] sm:$0xff]  ;;  %v388_v39 = vrot.slane %v1065_v57, %v387_v38 }
  0x80   :  { %690 = vmatpush3.bf16.msra.mxu0 %v689_v41 }
  0x81   :  { %672 = vmatpush3.bf16.msra.mxu1 %v671_v23  ;;  %691 = vmatprep.subr.bf16.mxu0 %v914_v0  ;;  %v725_v23 = vpack.c.bf16 %v382_v22, %v381_v21 }
  0x82   :  { %673 = vmatprep.subr.bf16.mxu1 %v914_v0 }
  0x84   :  { %693 = vmatpush3.bf16.msra.mxu0 %v692_v44 }
  0x85   :  { %675 = vmatpush3.bf16.msra.mxu1 %v674_v26  ;;  %694 = vmatprep.subr.bf16.mxu0 %v914_v0 }
  0x86   :  { %676 = vmatprep.subr.bf16.mxu1 %v914_v0 }
  0x88   :  { %696 = vmatpush3.bf16.msra.mxu0 %v695_v47 }
  0x89   :  { %678 = vmatpush3.bf16.msra.mxu1 %v677_v29  ;;  %697 = vmatprep.subr.bf16.mxu0 %v914_v0 }
  0x8a   :  { %679 = vmatprep.subr.bf16.mxu1 %v914_v0 }
  0x8c   :  { %699 = vmatpush3.bf16.msra.mxu0 %v698_v50 }
  0x8d   :  { %681 = vmatpush3.bf16.msra.mxu1 %v680_v32  ;;  %700 = vmatprep.subr.bf16.mxu0 %v914_v0  ;;  %v728_v32 = vpack.c.bf16 %v384_v31, %v383_v30 }
  0x8e   :  { %706 = vmatprep.subr.bf16.mxu1 %v914_v0 }
  0x90   :  { %702 = vmatpush3.bf16.msra.mxu0 %v701_v53 }
  0x91   :  { %703 = vmatprep.subr.bf16.mxu0 %v914_v0 }
  0x94   :  { %705 = vmatpush3.bf16.msra.mxu0 %v704_v3 }
 0x14a   :  { %v182_v59 = vpop.f32.mrb[0].mxu0 }
 0x14b   :  { %v183_v60 = vadd.f32 %v182_v59, %v111_v58  ;;  %v546_v61 = vpop.f32.mrb[1].mxu0 }
 0x14d   :  { %v186_v62 = vmax.f32 %v183_v60, 0.0 }
 0x14f   :  { %580 = vmatmul.mubr.f32.vlgmr.msra.gmra.mrb[0].mxu1 %v186_v62 }
 0x150   :  { %649 = vmatprep.mubr.msk.f32.mxu1 %vm915_vm0, %v916_v1  ;;  %708 = vmatpush3.bf16.msra.mxu1 %v707_v7  ;;  %v375_v1 = vld [vmem:[#allocation10 + $0x30] sm:$0xff] }
 0x151   :  { %709 = vmatprep.subr.bf16.mxu1 %v914_v0  ;;  %v716_v14 = vpack.c.bf16 %v376_v13, %v375_v1 }
 0x154   :  { %711 = vmatpush3.bf16.msra.mxu1 %v710_v9 }
 0x155   :  { %712 = vmatprep.subr.bf16.mxu1 %v914_v0 }
 0x158   :  { %714 = vmatpush3.bf16.msra.mxu1 %v713_v12 }
 0x159   :  { %715 = vmatprep.subr.bf16.mxu1 %v914_v0 }
 0x15c   :  { %717 = vmatpush3.bf16.msra.mxu1 %v716_v14 }
 0x15d   :  { %718 = vmatprep.subr.bf16.mxu1 %v914_v0 }
 0x160   :  { %720 = vmatpush3.bf16.msra.mxu1 %v719_v17 }
 0x161   :  { %721 = vmatprep.subr.bf16.mxu1 %v914_v0 }
 0x164   :  { %723 = vmatpush3.bf16.msra.mxu1 %v722_v20 }
 0x165   :  { %724 = vmatprep.subr.bf16.mxu1 %v914_v0 }
 0x168   :  { %726 = vmatpush3.bf16.msra.mxu1 %v725_v23 }
 0x169   :  { %727 = vmatprep.subr.bf16.mxu1 %v914_v0 }
 0x16c   :  { %729 = vmatpush3.bf16.msra.mxu1 %v728_v32 }
 0x222   :  { %v273_v26 = vpop.f32.mrb[0].mxu1 }
 0x223   :  { %v274_v27 = vadd.f32 %v273_v26, %v206_v25  ;;  %v581_v28 = vpop.f32.mrb[1].mxu1 }
 0x225   :  { %v277_v29 = vmax.f32 %v274_v27, 0.0 }
 0x227   :  { %615 = vmatmul.mubr.f32.vlgmr.msra.gmra.mrb[2].mxu0 %v277_v29 }
 0x2fa   :  { %v364_v35 = vpop.f32.mrb[2].mxu0 }
 0x2fb   :  { %v365_v36 = vadd.f32 %v364_v35, %v297_v34  ;;  %v616_v0 = vpop.f32.mrb[3].mxu0 }
 0x2fd   :  { %v368_v37 = vmax.f32 %v365_v36, 0.0 }
 0x2ff   :  { %650 = vmatmul.mubr.f32.vlgmr.msra.gmra.mrb[2].mxu1 %v368_v37 }
 0x3d2   :  { %v455_v40 = vpop.f32.mrb[2].mxu1 }
 0x3d3   :  { %v456_v41 = vadd.f32 %v455_v40, %v388_v39  ;;  %v651_v42 = vpop.f32.mrb[3].mxu1 }
 0x3d5   :  { %460 = vst.msk [vmem:[#allocation13] sm:$0xff] %vm459_vm2, %v456_v41 }
 0x3d6   :  { %885 = shalt.err (!%p882_p10)
}
 0x3d7   :  { %s886_s0 = scalar_lea.hbm %s1101_s6, 128 }
 0x3d8   :  { %p887_p11 = scmp.ne.s32.totalorder %s1101_s6, %s886_s0  ;;  %p890_p12 = scmp.lt.u32.totalorder %s886_s0, %s1101_s6 }
 0x3da   :  { %p892_p13 = pnand %p890_p12, %p887_p11 }
 0x3dc   :  { %895 = shalt.err (!%p892_p13)
}
 0x3dd   :  { %470 = dma.vmem_to_hbm [thread:$0]  %s468_s8, 128, %s1101_s6, [#allocation4]  }
 0x3de   :  { %904 = dma.done.wait [#allocation4], 128  }
 0x3df   :  { %905 = vsyncadd [#allocation4], 4294967168 }
 0x3e0   :  { %474 = vsyncpa [#allocation3], 1 }
 0x3e1   :  { %475 = vsyncpa [#allocation6], 1 }
 0x3e2   :  { %476 = vsyncpa [#allocation9], 1 }
 0x3e3   :  { %477 = vsyncpa [#allocation12], 1 }
 0x3e4   :  { %478 = vsyncpa [#allocation4], 1 }

</bundles_post_ra>
